<compile_context>
chip_gen: v7x
topology: tpu7x:2x2x1
jax: 0.10.0
libtpu: 0.0.40
codegen_flags: <defaults>
</compile_context>

<pallas_src>
import functools

import jax
import jax.numpy as jnp
from jax.experimental import pallas as pl
from jax.experimental.pallas import tpu as pltpu


# ---------------------------------------------------------------------------
# Fused Pallas kernel: x -> [Linear+ReLU]*(n-1) -> Linear
# ---------------------------------------------------------------------------
def _fused_mlp_kernel(n_layers, x_ref, *refs):
    """refs = (w0, b0, w1, b1, ..., w_{n-1}, b_{n-1}, o_ref)."""
    o_ref = refs[-1]
    wb = refs[:-1]
    h = x_ref[...]                              # bf16 activation tile
    for i in range(n_layers):                   # unrolled at trace time
        w = wb[2 * i][...]                      # bf16 (Din, Dout), VMEM-resident
        b = wb[2 * i + 1][...]                  # f32  (1, Dout)
        z = jnp.dot(h.astype(w.dtype), w,
                    preferred_element_type=jnp.float32) + b
        h = jnp.maximum(z, 0.0) if i < n_layers - 1 else z
    o_ref[...] = h                              # f32, lane-dense store


def fused_mlp(x, layers, out_cols):
    """Run the fused MLP. `layers` is a list of (W_bf16, b_f32); the last
    layer's W/b are lane-padded. Returns (B, out_cols) float32."""
    B, din = x.shape
    n_layers = len(layers)
    dout_pad = layers[-1][0].shape[1]

    TB = min(B, 512)                            # batch tile (>=8-row sublane rule
                                                # satisfied: TB==B or TB%8==0)
    grid = (pl.cdiv(B, TB),)

    in_specs = [pl.BlockSpec((TB, din), lambda i: (i, 0))]
    operands = [x.astype(jnp.bfloat16)]
    for (w, b) in layers:
        in_specs.append(pl.BlockSpec(w.shape, lambda i: (0, 0)))   # resident
        in_specs.append(pl.BlockSpec(b.shape, lambda i: (0, 0)))   # resident
        operands.extend([w, b])

    out = pl.pallas_call(
        functools.partial(_fused_mlp_kernel, n_layers),
        out_shape=jax.ShapeDtypeStruct((B, dout_pad), jnp.float32),
        grid=grid,
        in_specs=in_specs,
        out_specs=pl.BlockSpec((TB, dout_pad), lambda i: (i, 0)),
        compiler_params=pltpu.CompilerParams(
            dimension_semantics=("parallel",)),
    )(*operands)
    return out[:, :out_cols]


# ---------------------------------------------------------------------------
# Parameter construction (deterministic, synthetic) — matches PyTorch init
# ---------------------------------------------------------------------------
def _make_linear_params(key, din, dout):
    kw, kb = jax.random.split(key)
    bound = 1.0 / jnp.sqrt(jnp.float32(din))
    w = jax.random.uniform(kw, (din, dout), jnp.float32, -bound, bound)
    b = jax.random.uniform(kb, (1, dout), jnp.float32, -bound, bound)
    return w, b


def _make_bn_params(dim, eps=1e-5):
    # gamma=1, beta=0, running_mean=0, running_var=1 (PyTorch defaults).
    gamma = jnp.ones((1, dim), jnp.float32)
    beta = jnp.zeros((1, dim), jnp.float32)
    running_mean = jnp.zeros((1, dim), jnp.float32)
    running_var = jnp.ones((1, dim), jnp.float32)
    scale = gamma / jnp.sqrt(running_var + eps)
    shift = beta - running_mean * scale
    return scale, shift


def init_deepsurv_params(key, input_dim, enc_dims, surv_dims, proj_dims):
    params = {"encoder": [], "surv": []}
    dims = [input_dim] + list(enc_dims)
    for i in range(len(enc_dims)):
        key, k1 = jax.random.split(key)
        w, b = _make_linear_params(k1, dims[i], dims[i + 1])
        scale, shift = _make_bn_params(dims[i + 1])
        params["encoder"].append((w, b, scale, shift))

    key, kp = jax.random.split(key)
    params["proj_head"] = _make_linear_params(kp, enc_dims[-1], proj_dims)

    sdims = [enc_dims[-1]] + list(surv_dims)
    for i in range(len(surv_dims)):
        key, k1 = jax.random.split(key)
        w, b = _make_linear_params(k1, sdims[i], sdims[i + 1])
        scale, shift = _make_bn_params(sdims[i + 1])
        params["surv"].append((w, b, scale, shift))

    out_in = surv_dims[-1] if len(surv_dims) > 0 else enc_dims[-1]
    key, ko = jax.random.split(key)
    params["output"] = _make_linear_params(ko, out_in, 1)
    return params


# ---------------------------------------------------------------------------
# Parameter prep: fold eval-BN into downstream layers, pad head, cast bf16
# ---------------------------------------------------------------------------
def _fold_prev_bn(w, b, scale, shift):
    """Layer consumed y = h*scale + shift; rewrite it to consume h directly."""
    w_f = scale.reshape(-1, 1) * w          # (Din, Dout)
    b_f = shift @ w + b                     # (1, Dout)
    return w_f, b_f


def _pad_head(w, b):
    """Pad the head layer's output dim to a multiple of 128 lanes (zeros)."""
    dout = w.shape[1]
    pad = (-dout) % 128
    if pad:
        w = jnp.pad(w, ((0, 0), (0, pad)))
        b = jnp.pad(b, ((0, 0), (0, pad)))
    return w, b


def prepare_fused_paths(params):
    def fold_chain(blocks, prev_affine):
        layers = []
        for (w, b, scale, shift) in blocks:
            if prev_affine is not None:
                w, b = _fold_prev_bn(w, b, *prev_affine)
            layers.append((w, b))
            prev_affine = (scale, shift)
        return layers, prev_affine

    enc_layers, enc_affine = fold_chain(params["encoder"], None)

    # Risk path: encoder -> surv -> output(1)  (BN of each block folded forward)
    surv_layers, last_affine = fold_chain(params["surv"], enc_affine)
    wo, bo = params["output"]
    if last_affine is not None:
        wo, bo = _fold_prev_bn(wo, bo, *last_affine)
    risk_cols = wo.shape[1]
    wo, bo = _pad_head(wo, bo)
    risk_layers = enc_layers + surv_layers + [(wo, bo)]

    # Projection path: encoder -> proj_head  (last encoder BN folded forward)
    wp, bp = params["proj_head"]
    if enc_affine is not None:
        wp, bp = _fold_prev_bn(wp, bp, *enc_affine)
    proj_cols = wp.shape[1]
    wp, bp = _pad_head(wp, bp)
    proj_layers = enc_layers + [(wp, bp)]

    def cast(layers):
        return [(w.astype(jnp.bfloat16), b.astype(jnp.float32))
                for (w, b) in layers]

    return {"risk": (cast(risk_layers), risk_cols),
            "proj": (cast(proj_layers), proj_cols)}


# ---------------------------------------------------------------------------
# Forward pass (mirrors DeepSurv.forward)
# ---------------------------------------------------------------------------
@functools.partial(jax.jit, static_argnames=("out_cols",))
def _run_path(layers, x, out_cols):
    return fused_mlp(x, layers, out_cols)


def deepsurv_forward(fused, x, get_projection=False, get_emb=False):
    if get_projection or get_emb:
        layers, cols = fused["proj"]
        out = _run_path(layers, x, out_cols=cols)
        return jax.lax.stop_gradient(out) if get_emb else out   # .detach()
    layers, cols = fused["risk"]
    return _run_path(layers, x, out_cols=cols)


# ---------------------------------------------------------------------------
# Pure-JAX reference (unfolded, f32) for a loose numerical check
# ---------------------------------------------------------------------------
def deepsurv_reference(params, x, get_projection=False):
    h = x
    for (w, b, scale, shift) in params["encoder"]:
        h = jnp.maximum(h @ w + b, 0.0) * scale + shift
    wp, bp = params["proj_head"]
    x_proj = h @ wp + bp
    for (w, b, scale, shift) in params["surv"]:
        h = jnp.maximum(h @ w + b, 0.0) * scale + shift
    if get_projection:
        return x_proj
    wo, bo = params["output"]
    return h @ wo + bo


# ---------------------------------------------------------------------------
# Demo
# ---------------------------------------------------------------------------
if __name__ == "__main__":
    key = jax.random.PRNGKey(0)

    batch = 8
    input_dim = 16
    enc_dims = [32, 32]
    surv_dims = [32]
    proj_dims = 16
    dropout = 0.1  # identity in eval mode

    kx, kparams = jax.random.split(key)
    x = jax.random.normal(kx, (batch, input_dim), jnp.float32)
    params = init_deepsurv_params(kparams, input_dim, enc_dims, surv_dims,
                                  proj_dims)
    fused = prepare_fused_paths(params)

    # Default path: survival risk score, shape (batch, 1)
    risk = jax.block_until_ready(deepsurv_forward(fused, x))
    assert risk.shape == (batch, 1) and risk.dtype == jnp.float32

    # Projection / embedding paths: shape (batch, proj_dims)
    proj = jax.block_until_ready(deepsurv_forward(fused, x, get_projection=True))
    emb = jax.block_until_ready(deepsurv_forward(fused, x, get_emb=True))
    assert proj.shape == (batch, proj_dims)
    assert emb.shape == (batch, proj_dims)

    # Loose numerical check vs. f32 reference (bf16 matmul operands).
    risk_ref = deepsurv_reference(params, x)
    proj_ref = deepsurv_reference(params, x, get_projection=True)
    assert bool(jnp.all(jnp.isfinite(risk))) and bool(jnp.all(jnp.isfinite(proj)))
    assert bool(jnp.allclose(risk, risk_ref, atol=2e-1, rtol=2e-1))
    assert bool(jnp.allclose(proj, proj_ref, atol=2e-1, rtol=2e-1))

    print("KERNEL_OK")
</pallas_src>

<mosaic_0001>
module attributes {stable_mosaic.version = 11 : i64} {
  func.func @_fused_mlp_kernel(%arg0: i32, %arg1: memref<8x16xbf16, #tpu.memory_space<vmem>>, %arg2: memref<16x32xbf16, #tpu.memory_space<vmem>>, %arg3: memref<1x32xf32, #tpu.memory_space<vmem>>, %arg4: memref<32x32xbf16, #tpu.memory_space<vmem>>, %arg5: memref<1x32xf32, #tpu.memory_space<vmem>>, %arg6: memref<32x32xbf16, #tpu.memory_space<vmem>>, %arg7: memref<1x32xf32, #tpu.memory_space<vmem>>, %arg8: memref<32x128xbf16, #tpu.memory_space<vmem>>, %arg9: memref<1x128xf32, #tpu.memory_space<vmem>>, %arg10: memref<8x128xf32, #tpu.memory_space<vmem>>) attributes {dimension_semantics = [#tpu.dimension_semantics<parallel>], iteration_bounds = array<i64: 1>, scalar_prefetch = 0 : i64, scratch_operands = 0 : i64, tpu.core_type = #tpu.core_type<tc>, window_params = [{transform_indices = @transform_0, window_bounds = array<i64: 8, 16>}, {pipeline_mode = #tpu.pipeline_mode<synchronous>, transform_indices = @transform_1, window_bounds = array<i64: 16, 32>}, {pipeline_mode = #tpu.pipeline_mode<synchronous>, transform_indices = @transform_2, window_bounds = array<i64: 1, 32>}, {pipeline_mode = #tpu.pipeline_mode<synchronous>, transform_indices = @transform_3, window_bounds = array<i64: 32, 32>}, {pipeline_mode = #tpu.pipeline_mode<synchronous>, transform_indices = @transform_4, window_bounds = array<i64: 1, 32>}, {pipeline_mode = #tpu.pipeline_mode<synchronous>, transform_indices = @transform_5, window_bounds = array<i64: 32, 32>}, {pipeline_mode = #tpu.pipeline_mode<synchronous>, transform_indices = @transform_6, window_bounds = array<i64: 1, 32>}, {pipeline_mode = #tpu.pipeline_mode<synchronous>, transform_indices = @transform_7, window_bounds = array<i64: 32, 128>}, {pipeline_mode = #tpu.pipeline_mode<synchronous>, transform_indices = @transform_8, window_bounds = array<i64: 1, 128>}, {transform_indices = @transform_9, window_bounds = array<i64: 8, 128>}]} {
    %c0 = arith.constant 0 : index
    %c0_0 = arith.constant 0 : index
    %0 = vector.load %arg1[%c0, %c0_0] : memref<8x16xbf16, #tpu.memory_space<vmem>>, vector<8x16xbf16>
    %c0_1 = arith.constant 0 : index
    %c0_2 = arith.constant 0 : index
    %1 = vector.load %arg2[%c0_1, %c0_2] : memref<16x32xbf16, #tpu.memory_space<vmem>>, vector<16x32xbf16>
    %c0_3 = arith.constant 0 : index
    %c0_4 = arith.constant 0 : index
    %2 = vector.load %arg3[%c0_3, %c0_4] : memref<1x32xf32, #tpu.memory_space<vmem>>, vector<1x32xf32>
    %cst = arith.constant dense<0.000000e+00> : vector<8x32xf32>
    %3 = tpu.matmul %0, %1, %cst {dimension_numbers = #tpu.dot_dimension_numbers<[1], [0], [0], [1], [0, 0, 1, 1], [], []>} : vector<8x16xbf16>, vector<16x32xbf16>, vector<8x32xf32> -> vector<8x32xf32>
    %4 = vector.broadcast %2 : vector<1x32xf32> to vector<8x32xf32>
    %5 = arith.addf %3, %4 : vector<8x32xf32>
    %cst_5 = arith.constant 0.000000e+00 : f32
    %6 = vector.broadcast %cst_5 : f32 to vector<8x32xf32>
    %7 = arith.maximumf %5, %6 : vector<8x32xf32>
    %c0_6 = arith.constant 0 : index
    %c0_7 = arith.constant 0 : index
    %8 = vector.load %arg4[%c0_6, %c0_7] : memref<32x32xbf16, #tpu.memory_space<vmem>>, vector<32x32xbf16>
    %c0_8 = arith.constant 0 : index
    %c0_9 = arith.constant 0 : index
    %9 = vector.load %arg5[%c0_8, %c0_9] : memref<1x32xf32, #tpu.memory_space<vmem>>, vector<1x32xf32>
    %10 = arith.truncf %7 : vector<8x32xf32> to vector<8x32xbf16>
    %cst_10 = arith.constant dense<0.000000e+00> : vector<8x32xf32>
    %11 = tpu.matmul %10, %8, %cst_10 {dimension_numbers = #tpu.dot_dimension_numbers<[1], [0], [0], [1], [0, 0, 1, 1], [], []>} : vector<8x32xbf16>, vector<32x32xbf16>, vector<8x32xf32> -> vector<8x32xf32>
    %12 = vector.broadcast %9 : vector<1x32xf32> to vector<8x32xf32>
    %13 = arith.addf %11, %12 : vector<8x32xf32>
    %cst_11 = arith.constant 0.000000e+00 : f32
    %14 = vector.broadcast %cst_11 : f32 to vector<8x32xf32>
    %15 = arith.maximumf %13, %14 : vector<8x32xf32>
    %c0_12 = arith.constant 0 : index
    %c0_13 = arith.constant 0 : index
    %16 = vector.load %arg6[%c0_12, %c0_13] : memref<32x32xbf16, #tpu.memory_space<vmem>>, vector<32x32xbf16>
    %c0_14 = arith.constant 0 : index
    %c0_15 = arith.constant 0 : index
    %17 = vector.load %arg7[%c0_14, %c0_15] : memref<1x32xf32, #tpu.memory_space<vmem>>, vector<1x32xf32>
    %18 = arith.truncf %15 : vector<8x32xf32> to vector<8x32xbf16>
    %cst_16 = arith.constant dense<0.000000e+00> : vector<8x32xf32>
    %19 = tpu.matmul %18, %16, %cst_16 {dimension_numbers = #tpu.dot_dimension_numbers<[1], [0], [0], [1], [0, 0, 1, 1], [], []>} : vector<8x32xbf16>, vector<32x32xbf16>, vector<8x32xf32> -> vector<8x32xf32>
    %20 = vector.broadcast %17 : vector<1x32xf32> to vector<8x32xf32>
    %21 = arith.addf %19, %20 : vector<8x32xf32>
    %cst_17 = arith.constant 0.000000e+00 : f32
    %22 = vector.broadcast %cst_17 : f32 to vector<8x32xf32>
    %23 = arith.maximumf %21, %22 : vector<8x32xf32>
    %c0_18 = arith.constant 0 : index
    %c0_19 = arith.constant 0 : index
    %24 = vector.load %arg8[%c0_18, %c0_19] : memref<32x128xbf16, #tpu.memory_space<vmem>>, vector<32x128xbf16>
    %c0_20 = arith.constant 0 : index
    %c0_21 = arith.constant 0 : index
    %25 = vector.load %arg9[%c0_20, %c0_21] : memref<1x128xf32, #tpu.memory_space<vmem>>, vector<1x128xf32>
    %26 = arith.truncf %23 : vector<8x32xf32> to vector<8x32xbf16>
    %cst_22 = arith.constant dense<0.000000e+00> : vector<8x128xf32>
    %27 = tpu.matmul %26, %24, %cst_22 {dimension_numbers = #tpu.dot_dimension_numbers<[1], [0], [0], [1], [0, 0, 1, 1], [], []>} : vector<8x32xbf16>, vector<32x128xbf16>, vector<8x128xf32> -> vector<8x128xf32>
    %28 = vector.broadcast %25 : vector<1x128xf32> to vector<8x128xf32>
    %29 = arith.addf %27, %28 : vector<8x128xf32>
    %c0_23 = arith.constant 0 : index
    %c0_24 = arith.constant 0 : index
    %30 = vector.load %arg10[%c0_23, %c0_24] : memref<8x128xf32, #tpu.memory_space<vmem>>, vector<8x128xf32>
    tpu.vector_store %arg10[%c0_23, %c0_24], %29 {strides = array<i32>} : memref<8x128xf32, #tpu.memory_space<vmem>>, vector<8x128xf32>,
    return
  }
  func.func @transform_0(%arg0: i32) -> (i32, i32) {
    %c0_i32 = arith.constant 0 : i32
    %c0_i32_0 = arith.constant 0 : i32
    return %arg0, %c0_i32 : i32, i32
  }
  func.func @transform_1(%arg0: i32) -> (i32, i32) {
    %c0_i32 = arith.constant 0 : i32
    %c0_i32_0 = arith.constant 0 : i32
    %c0_i32_1 = arith.constant 0 : i32
    return %c0_i32, %c0_i32_0 : i32, i32
  }
  func.func @transform_2(%arg0: i32) -> (i32, i32) {
    %c0_i32 = arith.constant 0 : i32
    %c0_i32_0 = arith.constant 0 : i32
    %c0_i32_1 = arith.constant 0 : i32
    return %c0_i32, %c0_i32_0 : i32, i32
  }
  func.func @transform_3(%arg0: i32) -> (i32, i32) {
    %c0_i32 = arith.constant 0 : i32
    %c0_i32_0 = arith.constant 0 : i32
    %c0_i32_1 = arith.constant 0 : i32
    return %c0_i32, %c0_i32_0 : i32, i32
  }
  func.func @transform_4(%arg0: i32) -> (i32, i32) {
    %c0_i32 = arith.constant 0 : i32
    %c0_i32_0 = arith.constant 0 : i32
    %c0_i32_1 = arith.constant 0 : i32
    return %c0_i32, %c0_i32_0 : i32, i32
  }
  func.func @transform_5(%arg0: i32) -> (i32, i32) {
    %c0_i32 = arith.constant 0 : i32
    %c0_i32_0 = arith.constant 0 : i32
    %c0_i32_1 = arith.constant 0 : i32
    return %c0_i32, %c0_i32_0 : i32, i32
  }
  func.func @transform_6(%arg0: i32) -> (i32, i32) {
    %c0_i32 = arith.constant 0 : i32
    %c0_i32_0 = arith.constant 0 : i32
    %c0_i32_1 = arith.constant 0 : i32
    return %c0_i32, %c0_i32_0 : i32, i32
  }
  func.func @transform_7(%arg0: i32) -> (i32, i32) {
    %c0_i32 = arith.constant 0 : i32
    %c0_i32_0 = arith.constant 0 : i32
    %c0_i32_1 = arith.constant 0 : i32
    return %c0_i32, %c0_i32_0 : i32, i32
  }
  func.func @transform_8(%arg0: i32) -> (i32, i32) {
    %c0_i32 = arith.constant 0 : i32
    %c0_i32_0 = arith.constant 0 : i32
    %c0_i32_1 = arith.constant 0 : i32
    return %c0_i32, %c0_i32_0 : i32, i32
  }
  func.func @transform_9(%arg0: i32) -> (i32, i32) {
    %c0_i32 = arith.constant 0 : i32
    %c0_i32_0 = arith.constant 0 : i32
    return %arg0, %c0_i32 : i32, i32
  }
}

</mosaic_0001>

<bundles_post_ra>
// kernel: _run_path.1
= control target key start
LH: loop header
LB: loop body
LE: loop exit
PB: predicated region body
PF: predicated region fallthrough
CT: control target
= control target key end

     0   :  { %14 = vsyncpa [#allocation3], 0  ;;  %s666_s0 = inlined_call_operand.vmem [shape: bf16[8,16], index: 0, kind: input, shape index: {}]   ;;  %s667_s1 = inlined_call_operand.hbm [shape: bf16[16,32], index: 1, kind: input, shape index: {}]   ;;  %s668_s2 = inlined_call_operand.vmem [shape: f32[1,32], index: 2, kind: input, shape index: {}]   ;;  %s669_s3 = inlined_call_operand.vmem [shape: bf16[32,32], index: 3, kind: input, shape index: {}]   ;;  %s670_s4 = inlined_call_operand.vmem [shape: f32[1,32], index: 4, kind: input, shape index: {}]   ;;  %s671_s5 = inlined_call_operand.hbm [shape: bf16[32,32], index: 5, kind: input, shape index: {}]   ;;  %s672_s6 = inlined_call_operand.hbm [shape: f32[1,32], index: 6, kind: input, shape index: {}]   ;;  %s673_s7 = inlined_call_operand.vmem [shape: bf16[32,128], index: 7, kind: input, shape index: {}]   ;;  %s674_s8 = inlined_call_operand.hbm [shape: f32[1,128], index: 8, kind: input, shape index: {}]   ;;  %s675_s9 = inlined_call_operand.vmem [shape: f32[8,128], index: 9, kind: output, shape index: {}]  }
   0x1   :  { %15 = vsyncpa [#allocation5], 0 }
   0x2   :  { %16 = vsyncpa [#allocation8], 0  ;;  %s522_s30 = smov [#allocation4]   ;;  %s523_s11 = smov [#allocation2]  }
   0x3   :  { %s42_s10 = sshll.u32 %s522_s30, 4  ;;  %s24_s12 = sshll.u32 %s523_s11, 4  ;;  %s43_s10 = int_to_ptr.vmem [resolvable:$true] %s42_s10  ;;  %s580_s12 = int_to_ptr.vmem [resolvable:$true] %s24_s12 }
   0x4   :  { %s428_s15 = scalar_lea.hbm %s671_s5, 256 }
   0x5   :  { %p429_p0 = scmp.ne.s32.totalorder %s671_s5, %s428_s15  ;;  %p432_p1 = scmp.lt.u32.totalorder %s428_s15, %s671_s5 }
   0x7   :  { %p434_p2 = pnand %p432_p1, %p429_p0 }
   0x9   :  { %437 = shalt.err (!%p434_p2)
}
   0xa   :  { %s438_s20 = scalar_lea.vmem %s43_s10, 256  ;;  %p443_p4 = scmp.lt.s32.totalorder %s43_s10, %s43_s10 }
   0xb   :  { %p439_p3 = scmp.ne.s32.totalorder %s43_s10, %s438_s20  ;;  %p444_p5 = scmp.lt.s32.totalorder %s438_s20, %s438_s20 }
   0xd   :  { %p445_p6 = por %p444_p5, %p443_p4 }
   0xf   :  { %p446_p7 = pnand %p445_p6, %p439_p3 }
  0x11   :  { %449 = shalt.err (!%p446_p7)
}
  0x12   :  { %s524_s21 = smov 64   ;;  %s525_s22 = smov 4  }
  0x13   :  { %48 = dma.hbm_to_vmem [thread:$0]  %s671_s5, 256, %s43_s10, [#allocation5], %s524_s21, %s524_s21, %s525_s22  }
  0x14   :  { %s450_s27 = scalar_lea.hbm %s667_s1, 128 }
  0x15   :  { %p451_p8 = scmp.ne.s32.totalorder %s667_s1, %s450_s27  ;;  %p454_p9 = scmp.lt.u32.totalorder %s450_s27, %s667_s1 }
  0x17   :  { %p456_p10 = pnand %p454_p9, %p451_p8 }
  0x19   :  { %459 = shalt.err (!%p456_p10)
}
  0x1a   :  { %s460_s13 = scalar_lea.vmem %s580_s12, 128  ;;  %p465_p12 = scmp.lt.s32.totalorder %s580_s12, %s580_s12 }
  0x1b   :  { %p461_p11 = scmp.ne.s32.totalorder %s580_s12, %s460_s13  ;;  %p466_p13 = scmp.lt.s32.totalorder %s460_s13, %s460_s13 }
  0x1d   :  { %p467_p0 = por %p466_p13, %p465_p12 }
  0x1f   :  { %p468_p1 = pnand %p467_p0, %p461_p11 }
  0x21   :  { %471 = shalt.err (!%p468_p1)
}
  0x22   :  { %30 = dma.hbm_to_vmem [thread:$0]  %s667_s1, 128, %s580_s12, [#allocation3], %s524_s21, %s524_s21, %s525_s22  }
  0x23   :  { %s526_s14 = smov [#allocation6]   ;;  %s527_s16 = smov [#allocation7]  }
  0x24   :  { %s55_s15 = sshll.u32 %s526_s14, 4  ;;  %s67_s17 = sshll.u32 %s527_s16, 4  ;;  %s56_s15 = int_to_ptr.vmem [resolvable:$true] %s55_s15  ;;  %s68_s17 = int_to_ptr.vmem [resolvable:$true] %s67_s17 }
  0x25   :  { %s472_s20 = scalar_lea.hbm %s672_s6, 16 }
  0x26   :  { %p473_p2 = scmp.ne.s32.totalorder %s672_s6, %s472_s20  ;;  %p476_p3 = scmp.lt.u32.totalorder %s472_s20, %s672_s6 }
  0x28   :  { %p478_p4 = pnand %p476_p3, %p473_p2 }
  0x2a   :  { %481 = shalt.err (!%p478_p4)
}
  0x2b   :  { %s482_s1 = scalar_lea.vmem %s56_s15, 16  ;;  %s486_s12 = scalar_lea.vmem %s56_s15, 32 }
  0x2c   :  { %p483_p5 = scmp.ne.s32.totalorder %s56_s15, %s482_s1  ;;  %p487_p6 = scmp.lt.s32.totalorder %s56_s15, %s56_s15 }
  0x2d   :  { %p488_p7 = scmp.lt.s32.totalorder %s486_s12, %s482_s1 }
  0x2f   :  { %p489_p8 = por %p488_p7, %p487_p6 }
  0x31   :  { %p490_p9 = pnand %p489_p8, %p483_p5 }
  0x33   :  { %493 = shalt.err (!%p490_p9)
}
  0x34   :  { %58 = dma.hbm_to_vmem [thread:$0]  %s672_s6, 16, %s56_s15, [#allocation5]  }
  0x35   :  { %s494_s29 = scalar_lea.hbm %s674_s8, 16 }
  0x36   :  { %p495_p10 = scmp.ne.s32.totalorder %s674_s8, %s494_s29  ;;  %p498_p11 = scmp.lt.u32.totalorder %s494_s29, %s674_s8 }
  0x38   :  { %p500_p12 = pnand %p498_p11, %p495_p10 }
  0x3a   :  { %503 = shalt.err (!%p500_p12)
}
  0x3b   :  { %s504_s10 = scalar_lea.vmem %s68_s17, 16  ;;  %s508_s14 = scalar_lea.vmem %s68_s17, 32 }
  0x3c   :  { %p505_p13 = scmp.ne.s32.totalorder %s68_s17, %s504_s10  ;;  %p509_p0 = scmp.lt.s32.totalorder %s68_s17, %s68_s17 }
  0x3d   :  { %p510_p1 = scmp.lt.s32.totalorder %s508_s14, %s504_s10 }
  0x3f   :  { %p511_p2 = por %p510_p1, %p509_p0 }
  0x41   :  { %p512_p3 = pnand %p511_p2, %p505_p13 }
  0x43   :  { %515 = shalt.err (!%p512_p3)
}
  0x44   :  { %70 = dma.hbm_to_vmem [thread:$0]  %s674_s8, 16, %s68_s17, [#allocation8]  }
  0x45   :  { %516 = dma.done.wait [#allocation3], 128  }
  0x46   :  { %517 = vsyncadd [#allocation3], 4294967168 }
  0x47   :  { %518 = dma.done.wait [#allocation5], 272  }
  0x48   :  { %519 = vsyncadd [#allocation5], 4294967024 }
  0x49   :  { %520 = dma.done.wait [#allocation8], 16  }
  0x4a   :  { %521 = vsyncadd [#allocation8], 4294967280  ;;  %v528_v0 = vmov 0.0   ;;  %vm529_vm0 = vmmov 0   ;;  %v421_v1 = vld [vmem:[#allocation2] sm:$0xff]   ;;  %vm100_vm1 = vcmask 130048  }
  0x4b   :  { %383 = vmatprep.subr.bf16.mxu0 %v528_v0  ;;  %385 = vmatprep.mubr.msk.bf16.mxu0 %vm529_vm0, %v528_v0  ;;  %v84_v2 = vld [vmem:[%s666_s0] sm:$0xf]  ;;  %v423_v4 = vld [vmem:[%s669_s3 + $0x8] sm:$0xff]   ;;  %vm169_vm2 = vcmask 261120   ;;  %v425_v14 = vld [vmem:[#allocation4 + $0x8] sm:$0xff]  }
  0x4c   :  { %389 = vmatprep.subr.bf16.mxu1 %v528_v0  ;;  %393 = vmatprep.mubr.msk.bf16.mxu1 %vm529_vm0, %v528_v0  ;;  %v422_v3 = vld [vmem:[%s669_s3] sm:$0xff]   ;;  %v424_v5 = vld [vmem:[#allocation4] sm:$0xff]   ;;  %v364_v25 = vld [vmem:[#allocation6] ss:$0 sm:$0xff] }
  0x4d   :  { %384 = vmatpush3.bf16.msra.mxu0 %v421_v1  ;;  %390 = vmatpush3.bf16.msra.mxu1 %v422_v3  ;;  %v357_v6 = vld [vmem:[%s668_s2] ss:$0 sm:$0xff]  ;;  %v427_v24 = vld [vmem:[%s673_s7 + $0x8] sm:$0xff]   ;;  %v368_v33 = vld [vmem:[#allocation7] ss:$0 sm:$0xff] }
  0x4e   :  { %397 = vmatprep.subr.bf16.mxu0 %v528_v0  ;;  %391 = vmatprep.subr.bf16.mxu1 %v528_v0  ;;  %v426_v15 = vld [vmem:[%s673_s7] sm:$0xff]  }
  0x4f   :  { %v360_v16 = vld [vmem:[%s670_s4] ss:$0 sm:$0xff] }
  0x50   :  { %386 = vmatmul.mubr.msk.bf16.vlgmr.msra.gmra.mrb[0].mxu0 %vm100_vm1, %v84_v2 }
  0x51   :  { %401 = vmatprep.mubr.msk.bf16.mxu0 %vm529_vm0, %v528_v0  ;;  %392 = vmatpush3.bf16.msra.mxu1 %v423_v4 }
  0x52   :  { %405 = vmatprep.subr.bf16.mxu1 %v528_v0  ;;  %398 = vmatpush3.bf16.msra.mxu0 %v424_v5 }
  0x53   :  { %399 = vmatprep.subr.bf16.mxu0 %v528_v0 }
  0x56   :  { %400 = vmatpush3.bf16.msra.mxu0 %v425_v14 }
 0x123   :  { %v138_v7 = vpop.f32.mrb[0].mxu0 }
 0x124   :  { %v139_v8 = vadd.f32 %v357_v6, %v138_v7  ;;  %v387_v9 = vpop.f32.mrb[1].mxu0 }
 0x125   :  { %v141_v10 = vpop.f32.mrb[2].mxu0 }
 0x126   :  { %v144_v11 = vmax.f32 %v139_v8, 0.0  ;;  %v388_v12 = vpop.f32.mrb[3].mxu0 }
 0x128   :  { %v150_v13 = vpack.c.bf16 %v144_v11, %v144_v11 }
 0x12a   :  { %394 = vmatmul.mubr.msk.bf16.vlgmr.msra.gmra.mrb[0].mxu1 %vm169_vm2, %v150_v13 }
 0x12b   :  { %409 = vmatprep.mubr.msk.bf16.mxu1 %vm529_vm0, %v528_v0  ;;  %406 = vmatpush3.bf16.msra.mxu1 %v426_v15 }
 0x12c   :  { %407 = vmatprep.subr.bf16.mxu1 %v528_v0 }
 0x12f   :  { %408 = vmatpush3.bf16.msra.mxu1 %v427_v24 }
 0x1fd   :  { %v207_v17 = vpop.f32.mrb[0].mxu1 }
 0x1fe   :  { %v208_v18 = vadd.f32 %v360_v16, %v207_v17  ;;  %v395_v19 = vpop.f32.mrb[1].mxu1 }
 0x1ff   :  { %v210_v20 = vpop.f32.mrb[2].mxu1 }
 0x200   :  { %v213_v21 = vmax.f32 %v208_v18, 0.0  ;;  %v396_v22 = vpop.f32.mrb[3].mxu1 }
 0x202   :  { %v219_v23 = vpack.c.bf16 %v213_v21, %v213_v21 }
 0x204   :  { %402 = vmatmul.mubr.msk.bf16.vlgmr.msra.gmra.mrb[4].mxu0 %vm169_vm2, %v219_v23 }
 0x2d7   :  { %v275_v26 = vpop.f32.mrb[4].mxu0 }
 0x2d8   :  { %v276_v27 = vadd.f32 %v364_v25, %v275_v26  ;;  %v403_v28 = vpop.f32.mrb[5].mxu0 }
 0x2d9   :  { %v278_v29 = vpop.f32.mrb[6].mxu0 }
 0x2da   :  { %v281_v30 = vmax.f32 %v276_v27, 0.0  ;;  %v404_v31 = vpop.f32.mrb[7].mxu0 }
 0x2dc   :  { %v287_v32 = vpack.c.bf16 %v281_v30, %v281_v30 }
 0x2de   :  { %410 = vmatmul.mubr.msk.bf16.vlgmr.msra.gmra.mrb[4].mxu1 %vm169_vm2, %v287_v32 }
 0x3b1   :  { %v343_v34 = vpop.f32.mrb[4].mxu1 }
 0x3b2   :  { %v344_v35 = vadd.f32 %v368_v33, %v343_v34  ;;  %v411_v36 = vpop.f32.mrb[5].mxu1 }
 0x3b3   :  { %v346_v37 = vpop.f32.mrb[6].mxu1 }
 0x3b4   :  { %349 = vst [vmem:[%s675_s9] sm:$0xff] %v344_v35  ;;  %v412_v38 = vpop.f32.mrb[7].mxu1 }
 0x3b5   :  { %354 = vsyncpa [#allocation3], 1 }
 0x3b6   :  { %355 = vsyncpa [#allocation5], 1 }
 0x3b7   :  { %356 = vsyncpa [#allocation8], 1 }

</bundles_post_ra>
